<compile_context>
chip_gen: v7x
topology: tpu7x:2x2x1
jax: 0.10.0
libtpu: 0.0.40
codegen_flags: <defaults>
</compile_context>

<pallas_src>
import math

import jax
import jax.numpy as jnp
from jax import lax
from jax.experimental import pallas as pl
from jax.experimental.pallas import tpu as pltpu

_INF = 1e12                      # matches LearnableLogOptimalTransport default inf
_VMEM_LIMIT = 32 * 1024 * 1024   # safe on v5e/v6e (128 MiB) and v7x (64 MiB physical)
_MAX_ROW_TILE = 512              # 85%+ of HBM roofline at >=512-wide tiles


# ----------------------------------------------------------------------------- helpers

def _round_up(n, m):
    return ((n + m - 1) // m) * m


def _row_tile(n, max_tile=_MAX_ROW_TILE):
    # multiple of 16 so the same tile works for f32 (8,128) and bf16 (16,128) layouts
    return min(max_tile, _round_up(n, 16))


def _zero_pad_rows(x, target):
    pad = target - x.shape[0]
    if pad <= 0:
        return x
    return jnp.concatenate([x, jnp.zeros((pad,) + x.shape[1:], x.dtype)], axis=0)


def _repeat_pad_rows(x, target):
    pad = target - x.shape[0]
    if pad <= 0:
        return x
    return jnp.concatenate([x, jnp.broadcast_to(x[:1], (pad,) + x.shape[1:])], axis=0)


# ----------------------------------------------------------------------------- kernels

def pairwise_sq_dist(a, b, normalized=False):
    """Squared pairwise distances, clamped at 0 (geotransformer pairwise_distance).

    Tiled over the (large) point axis; the node array and |b|^2 row stay resident.
    """
    N, D = a.shape
    M = b.shape[0]
    a = a.astype(jnp.float32)
    b = b.astype(jnp.float32)

    tile = _row_tile(N)
    Np = _round_up(N, tile)
    a_p = _zero_pad_rows(a, Np)
    grid = (Np // tile,)
    cp = pltpu.CompilerParams(dimension_semantics=("parallel",),
                              vmem_limit_bytes=_VMEM_LIMIT)

    if normalized:
        def kernel(a_ref, b_ref, o_ref):
            xy = lax.dot_general(a_ref[...], b_ref[...], (((1,), (1,)), ((), ())),
                                 preferred_element_type=jnp.float32)
            o_ref[...] = jnp.maximum(2.0 - 2.0 * xy, 0.0)

        out = pl.pallas_call(
            kernel,
            out_shape=jax.ShapeDtypeStruct((Np, M), jnp.float32),
            grid=grid,
            in_specs=[pl.BlockSpec((tile, D), lambda i: (i, 0)),
                      pl.BlockSpec((M, D), lambda i: (0, 0))],
            out_specs=pl.BlockSpec((tile, M), lambda i: (i, 0)),
            compiler_params=cp,
        )(a_p, b)
    else:
        b2 = jnp.sum(b * b, axis=1)[None, :]   # (1, M), computed once, resident across tiles

        def kernel(a_ref, b_ref, b2_ref, o_ref):
            av = a_ref[...]
            xy = lax.dot_general(av, b_ref[...], (((1,), (1,)), ((), ())),
                                 preferred_element_type=jnp.float32)
            a2 = jnp.sum(av * av, axis=1, keepdims=True)
            o_ref[...] = jnp.maximum(a2 - 2.0 * xy + b2_ref[...], 0.0)

        out = pl.pallas_call(
            kernel,
            out_shape=jax.ShapeDtypeStruct((Np, M), jnp.float32),
            grid=grid,
            in_specs=[pl.BlockSpec((tile, D), lambda i: (i, 0)),
                      pl.BlockSpec((M, D), lambda i: (0, 0)),
                      pl.BlockSpec((1, M), lambda i: (0, 0))],
            out_specs=pl.BlockSpec((tile, M), lambda i: (i, 0)),
            compiler_params=cp,
        )(a_p, b, b2)

    return out[:N]


def linear(x, w, normalize=False, compute_dtype=jnp.float32):
    """y = x @ w, row-tiled, weight VMEM-resident. Optional fused row-wise L2 norm
    (== F.normalize(p=2, dim=1), eps=1e-12). Accumulation is always f32."""
    N, Din = x.shape
    Dout = w.shape[1]

    tile = _row_tile(N)
    Np = _round_up(N, tile)
    x_p = _zero_pad_rows(x.astype(compute_dtype), Np)
    w_c = w.astype(compute_dtype)

    def kernel(x_ref, w_ref, o_ref):
        y = jnp.dot(x_ref[...], w_ref[...], preferred_element_type=jnp.float32)
        if normalize:
            n = jnp.sqrt(jnp.sum(y * y, axis=1, keepdims=True))
            y = y / jnp.maximum(n, 1e-12)
        o_ref[...] = y

    out = pl.pallas_call(
        kernel,
        out_shape=jax.ShapeDtypeStruct((Np, Dout), jnp.float32),
        grid=(Np // tile,),
        in_specs=[pl.BlockSpec((tile, Din), lambda i: (i, 0)),
                  pl.BlockSpec((Din, Dout), lambda i: (0, 0))],
        out_specs=pl.BlockSpec((tile, Dout), lambda i: (i, 0)),
        compiler_params=pltpu.CompilerParams(dimension_semantics=("parallel",),
                                             vmem_limit_bytes=_VMEM_LIMIT),
    )(x_p, w_c)
    return out[:N]


def coarse_matching_scores(ref_feats, src_feats, ref_masks, src_masks):
    """SuperPointMatching score map: exp(-d^2) with dual normalization, masked.

    Dual normalization needs global row/col sums => single block (coarse level is small).
    Masks enter as (N,1) and (1,M) so the (N,M) mask is a broadcast (no transpose).
    """
    N, D = ref_feats.shape
    M = src_feats.shape[0]
    rm = ref_masks.astype(jnp.float32).reshape(N, 1)
    sm = src_masks.astype(jnp.float32).reshape(1, M)

    def kernel(rf_ref, sf_ref, rm_ref, sm_ref, o_ref):
        xy = lax.dot_general(rf_ref[...], sf_ref[...], (((1,), (1,)), ((), ())),
                             preferred_element_type=jnp.float32)
        d2 = jnp.maximum(2.0 - 2.0 * xy, 0.0)     # feats are unit-norm (normalized=True)
        sc = jnp.exp(-d2)
        mask = rm_ref[...] * sm_ref[...]          # (N,1)*(1,M) -> (N,M)
        sc = sc * mask                            # == dropping masked rows/cols from the sums
        row_sum = jnp.maximum(jnp.sum(sc, axis=1, keepdims=True), 1e-30)
        col_sum = jnp.maximum(jnp.sum(sc, axis=0, keepdims=True), 1e-30)
        o_ref[...] = (sc / row_sum) * (sc / col_sum) * mask

    return pl.pallas_call(
        kernel,
        out_shape=jax.ShapeDtypeStruct((N, M), jnp.float32),
        grid=(1,),
        in_specs=[pl.BlockSpec((N, D), lambda i: (0, 0)),
                  pl.BlockSpec((M, D), lambda i: (0, 0)),
                  pl.BlockSpec((N, 1), lambda i: (0, 0)),
                  pl.BlockSpec((1, M), lambda i: (0, 0))],
        out_specs=pl.BlockSpec((N, M), lambda i: (0, 0)),
        compiler_params=pltpu.CompilerParams(vmem_limit_bytes=_VMEM_LIMIT),
    )(ref_feats.astype(jnp.float32), src_feats.astype(jnp.float32), rm, sm)


def patch_matching_ot(ref_knn_feats, src_knn_feats, ref_knn_masks, src_knn_masks,
                      alpha, num_iterations, scale):
    """Fused: einsum('bnd,bmd->bnm')/scale  +  dustbin/alpha padding + masking  +
    log-domain Sinkhorn (LearnableLogOptimalTransport.forward), processed in groups
    of patches per grid step so the correlation intermediate never leaves VMEM."""
    B, K, D = ref_knn_feats.shape
    R = K + 1
    C = K + 1
    inv_scale = 1.0 / float(scale)
    n_iters = int(num_iterations)

    # zero-padded dustbin feature row -> its correlation is exactly 0, then
    # overwritten with alpha inside the kernel (matches the torch padding).
    zpad = jnp.zeros((B, 1, D), jnp.float32)
    ref_p = jnp.concatenate([ref_knn_feats.astype(jnp.float32), zpad], axis=1)   # (B, R, D)
    src_p = jnp.concatenate([src_knn_feats.astype(jnp.float32), zpad], axis=1)   # (B, C, D)

    pad_false = jnp.zeros((B, 1), jnp.bool_)
    padded_row_invalid = jnp.concatenate([~ref_knn_masks, pad_false], axis=1)    # (B, R)
    padded_col_invalid = jnp.concatenate([~src_knn_masks, pad_false], axis=1)    # (B, C)

    num_valid_row = jnp.sum(ref_knn_masks.astype(jnp.float32), axis=1)
    num_valid_col = jnp.sum(src_knn_masks.astype(jnp.float32), axis=1)
    norm = -jnp.log(num_valid_row + num_valid_col)                               # (B,)

    log_mu = jnp.concatenate([jnp.broadcast_to(norm[:, None], (B, K)),
                              (jnp.log(num_valid_col) + norm)[:, None]], axis=1)
    log_mu = jnp.where(padded_row_invalid, -_INF, log_mu)
    log_nu = jnp.concatenate([jnp.broadcast_to(norm[:, None], (B, K)),
                              (jnp.log(num_valid_row) + norm)[:, None]], axis=1)
    log_nu = jnp.where(padded_col_invalid, -_INF, log_nu)

    # group patches per grid step (fills sublanes, amortizes ~600-cycle step overhead)
    g = min(8, B)
    Bp = _round_up(B, g)
    ref_p = _repeat_pad_rows(ref_p, Bp)
    src_p = _repeat_pad_rows(src_p, Bp)
    inv_row = _repeat_pad_rows(padded_row_invalid.astype(jnp.float32), Bp)
    inv_col = _repeat_pad_rows(padded_col_invalid.astype(jnp.float32), Bp)
    log_mu = _repeat_pad_rows(log_mu, Bp)
    log_nu = _repeat_pad_rows(log_nu, Bp)
    norm_col = _repeat_pad_rows(norm[:, None], Bp)                               # (Bp, 1)
    alpha_arr = jnp.asarray(alpha, jnp.float32).reshape(1, 1)

    def kernel(alpha_ref, r_ref, s_ref, ir_ref, ic_ref, mu_ref, nu_ref, nm_ref, o_ref):
        a = alpha_ref[0, 0]
        # batched correlation, contraction on the trailing feature axis (no transpose)
        sc = lax.dot_general(r_ref[...], s_ref[...], (((2,), (2,)), ((0,), (0,))),
                             preferred_element_type=jnp.float32) * inv_scale     # (g, R, C)
        row_idx = lax.broadcasted_iota(jnp.int32, (g, R, C), 1)
        col_idx = lax.broadcasted_iota(jnp.int32, (g, R, C), 2)
        in_core = jnp.logical_and(row_idx < K, col_idx < K)
        Z = jnp.where(in_core, sc, a)                                            # alpha border
        invalid = jnp.maximum(ir_ref[...][:, :, None], ic_ref[...][:, None, :]) > 0.5
        Z = jnp.where(invalid, -_INF, Z)

        lm = mu_ref[...][:, :, None]    # (g, R, 1)
        ln = nu_ref[...][:, None, :]    # (g, 1, C)
        u = jnp.zeros_like(lm)
        v = jnp.zeros_like(ln)
        for _ in range(n_iters):        # static trip count -> fully unrolled
            zu = Z + v
            mr = jnp.max(zu, axis=2, keepdims=True)
            u = lm - (mr + jnp.log(jnp.sum(jnp.exp(zu - mr), axis=2, keepdims=True)))
            zv = Z + u
            mc = jnp.max(zv, axis=1, keepdims=True)
            v = ln - (mc + jnp.log(jnp.sum(jnp.exp(zv - mc), axis=1, keepdims=True)))

        o_ref[...] = Z + u + v - nm_ref[...][:, :, None]

    out = pl.pallas_call(
        kernel,
        out_shape=jax.ShapeDtypeStruct((Bp, R, C), jnp.float32),
        grid=(Bp // g,),
        in_specs=[pl.BlockSpec(memory_space=pltpu.MemorySpace.SMEM),     # alpha scalar
                  pl.BlockSpec((g, R, D), lambda i: (i, 0, 0)),
                  pl.BlockSpec((g, C, D), lambda i: (i, 0, 0)),
                  pl.BlockSpec((g, R), lambda i: (i, 0)),
                  pl.BlockSpec((g, C), lambda i: (i, 0)),
                  pl.BlockSpec((g, R), lambda i: (i, 0)),
                  pl.BlockSpec((g, C), lambda i: (i, 0)),
                  pl.BlockSpec((g, 1), lambda i: (i, 0))],
        out_specs=pl.BlockSpec((g, R, C), lambda i: (i, 0, 0)),
        compiler_params=pltpu.CompilerParams(dimension_semantics=("parallel",),
                                             vmem_limit_bytes=_VMEM_LIMIT),
    )(alpha_arr, ref_p, src_p, inv_row, inv_col, log_mu, log_nu, norm_col)
    return out[:B]


# ----------------------------------------------------------------------------- module logic (glue)

def point_to_node_partition(points, nodes, point_limit):
    """Faithful port of geotransformer point_to_node_partition (pairwise dist in Pallas)."""
    num_points = points.shape[0]
    num_nodes = nodes.shape[0]
    sq = pairwise_sq_dist(points, nodes)                       # (N, M)
    point_to_node = jnp.argmin(sq, axis=1)                     # (N,)
    node_masks = jnp.zeros((num_nodes,), jnp.bool_).at[point_to_node].set(True)
    matching_masks = point_to_node[:, None] == jnp.arange(num_nodes)[None, :]
    sq = jnp.where(matching_masks, sq, 1e12)
    _, node_knn_indices = lax.top_k((-sq).T, point_limit)      # (M, K), smallest distances
    node_knn_node_indices = point_to_node[node_knn_indices]    # (M, K)
    node_indices = jnp.arange(num_nodes)[:, None]
    node_knn_masks = node_knn_node_indices == node_indices     # (M, K)
    node_knn_indices = jnp.where(node_knn_masks, node_knn_indices, num_points)
    return point_to_node, node_masks, node_knn_indices, node_knn_masks


def superpoint_matching(ref_feats, src_feats, ref_masks, src_masks, num_correspondences):
    """SuperPointMatching with dual_normalization=True (score map in Pallas)."""
    scores = coarse_matching_scores(ref_feats, src_feats, ref_masks, src_masks)
    M = scores.shape[1]
    k = min(num_correspondences, scores.size)
    corr_scores, corr_indices = lax.top_k(scores.reshape(-1), k)
    ref_corr_indices = corr_indices // M
    src_corr_indices = corr_indices % M
    return ref_corr_indices, src_corr_indices, corr_scores


def geo_transformer_forward(params, data_dict, cfg):
    output_dict = {}

    feats = data_dict['features']
    transform = data_dict['transform']
    ref_length_c = int(data_dict['lengths'][-1][0])
    ref_length_f = int(data_dict['lengths'][1][0])
    ref_length = int(data_dict['lengths'][0][0])
    points_c = data_dict['points'][-1]
    points_f = data_dict['points'][1]
    points = data_dict['points'][0]

    ref_points_c = points_c[:ref_length_c]
    src_points_c = points_c[ref_length_c:]
    ref_points_f = points_f[:ref_length_f]
    src_points_f = points_f[ref_length_f:]
    ref_points = points[:ref_length]
    src_points = points[ref_length:]
    output_dict.update(ref_points_c=ref_points_c, src_points_c=src_points_c,
                       ref_points_f=ref_points_f, src_points_f=src_points_f,
                       ref_points=ref_points, src_points=src_points)

    K = cfg['num_points_in_patch']
    _, ref_node_masks, ref_node_knn_indices, ref_node_knn_masks = point_to_node_partition(
        ref_points_f, ref_points_c, K)
    _, src_node_masks, src_node_knn_indices, src_node_knn_masks = point_to_node_partition(
        src_points_f, src_points_c, K)

    ref_padded_points_f = jnp.concatenate([ref_points_f, jnp.zeros_like(ref_points_f[:1])], axis=0)
    src_padded_points_f = jnp.concatenate([src_points_f, jnp.zeros_like(src_points_f[:1])], axis=0)
    ref_node_knn_points = ref_padded_points_f[ref_node_knn_indices]
    src_node_knn_points = src_padded_points_f[src_node_knn_indices]

    # TODO(synk): get_node_correspondences / SuperPointTargetGenerator (ground-truth generation,
    # training-only, uses `transform`) — source not provided; omitted.
    del transform, feats

    # TODO(synk): KPConvFPN internals (ConvBlock/ResidualBlock/UnaryBlock KPConv kernels) were not
    # provided; replaced by a deterministic Pallas linear projection producing same-shape features.
    feats_c = linear(points_c, params['w_backbone_c'])          # (Nc+Mc, d_backbone_c)
    feats_f = linear(points_f, params['w_backbone_f'])          # (Nf+Mf, d_f)

    # TODO(synk): GeometricTransformer (geometric self/cross attention) source not provided;
    # replaced by a deterministic Pallas linear projection (bf16 MXU, f32 accum) with the
    # L2 normalization fused into the kernel epilogue.
    feats_c_norm = linear(feats_c, params['w_transformer'],
                          normalize=True, compute_dtype=jnp.bfloat16)
    ref_feats_c_norm = feats_c_norm[:ref_length_c]
    src_feats_c_norm = feats_c_norm[ref_length_c:]
    output_dict['ref_feats_c'] = ref_feats_c_norm
    output_dict['src_feats_c'] = src_feats_c_norm

    ref_feats_f = feats_f[:ref_length_f]
    src_feats_f = feats_f[ref_length_f:]
    output_dict['ref_feats_f'] = ref_feats_f
    output_dict['src_feats_f'] = src_feats_f

    # coarse matching (inference path)
    ref_node_corr_indices, src_node_corr_indices, node_corr_scores = superpoint_matching(
        ref_feats_c_norm, src_feats_c_norm, ref_node_masks, src_node_masks,
        cfg['num_correspondences'])
    output_dict['ref_node_corr_indices'] = ref_node_corr_indices
    output_dict['src_node_corr_indices'] = src_node_corr_indices

    ref_node_corr_knn_indices = ref_node_knn_indices[ref_node_corr_indices]
    src_node_corr_knn_indices = src_node_knn_indices[src_node_corr_indices]
    ref_node_corr_knn_masks = ref_node_knn_masks[ref_node_corr_indices]
    src_node_corr_knn_masks = src_node_knn_masks[src_node_corr_indices]
    ref_node_corr_knn_points = ref_node_knn_points[ref_node_corr_indices]
    src_node_corr_knn_points = src_node_knn_points[src_node_corr_indices]

    ref_padded_feats_f = jnp.concatenate([ref_feats_f, jnp.zeros_like(ref_feats_f[:1])], axis=0)
    src_padded_feats_f = jnp.concatenate([src_feats_f, jnp.zeros_like(src_feats_f[:1])], axis=0)
    ref_node_corr_knn_feats = ref_padded_feats_f[ref_node_corr_knn_indices]   # (B, K, d_f)
    src_node_corr_knn_feats = src_padded_feats_f[src_node_corr_knn_indices]   # (B, K, d_f)

    output_dict['ref_node_corr_knn_points'] = ref_node_corr_knn_points
    output_dict['src_node_corr_knn_points'] = src_node_corr_knn_points
    output_dict['ref_node_corr_knn_masks'] = ref_node_corr_knn_masks
    output_dict['src_node_corr_knn_masks'] = src_node_corr_knn_masks

    # fused patch correlation + optimal transport (single Pallas kernel)
    matching_scores = patch_matching_ot(
        ref_node_corr_knn_feats, src_node_corr_knn_feats,
        ref_node_corr_knn_masks, src_node_corr_knn_masks,
        params['alpha'], cfg['num_sinkhorn_iterations'],
        math.sqrt(feats_f.shape[1]))
    output_dict['matching_scores'] = matching_scores
    output_dict['node_corr_scores'] = node_corr_scores

    # TODO(synk): LocalGlobalRegistration (fine matching: mutual top-k, dynamic nonzero selection,
    # weighted-SVD Procrustes refinement) — source not provided; omitted.
    return output_dict


# ----------------------------------------------------------------------------- main

if __name__ == "__main__":
    key = jax.random.PRNGKey(0)
    k_r, k_s, k_wf, k_wc, k_wt = jax.random.split(key, 5)

    N_f, M_f = 24, 28          # fine points (ref / src)
    d_f = 32                   # backbone fine output dim
    d_bc = 64                  # backbone coarse output dim
    d_c = 64                   # transformer output dim

    ref_points_f = jax.random.normal(k_r, (N_f, 3), jnp.float32)
    src_points_f = jax.random.normal(k_s, (M_f, 3), jnp.float32)
    ref_points_c = ref_points_f[::4]                 # (6, 3) coarse = subsampled fine
    src_points_c = src_points_f[::4]                 # (7, 3)
    N_c, M_c = ref_points_c.shape[0], src_points_c.shape[0]

    points_f = jnp.concatenate([ref_points_f, src_points_f], axis=0)   # (52, 3)
    points_c = jnp.concatenate([ref_points_c, src_points_c], axis=0)   # (13, 3)

    data_dict = {
        'features': jnp.ones((N_f + M_f, 1), jnp.float32),
        'transform': jnp.eye(4, dtype=jnp.float32),
        'points': [points_f, points_f, points_c],
        'lengths': [jnp.array([N_f, M_f]), jnp.array([N_f, M_f]), jnp.array([N_c, M_c])],
    }

    params = {
        'w_backbone_f': jax.random.normal(k_wf, (3, d_f), jnp.float32) / math.sqrt(3.0),
        'w_backbone_c': jax.random.normal(k_wc, (3, d_bc), jnp.float32) / math.sqrt(3.0),
        'w_transformer': jax.random.normal(k_wt, (d_bc, d_c), jnp.float32) / math.sqrt(d_bc),
        'alpha': jnp.float32(1.0),      # LearnableLogOptimalTransport.alpha init
    }

    cfg = {
        'num_points_in_patch': 8,
        'num_correspondences': 4,
        'num_sinkhorn_iterations': 10,
    }

    out = geo_transformer_forward(params, data_dict, cfg)
    jax.block_until_ready(out['matching_scores'])

    assert out['matching_scores'].shape == (cfg['num_correspondences'],
                                            cfg['num_points_in_patch'] + 1,
                                            cfg['num_points_in_patch'] + 1)
    assert bool(jnp.all(jnp.isfinite(out['matching_scores'])))
    assert bool(jnp.all(jnp.isfinite(out['ref_feats_c'])))
    assert bool(jnp.all(jnp.isfinite(out['node_corr_scores'])))
    print("KERNEL_OK")
</pallas_src>

<mosaic_0001>
module attributes {stable_mosaic.version = 11 : i64} {
  func.func @kernel(%arg0: i32, %arg1: memref<32x3xf32, #tpu.memory_space<vmem>>, %arg2: memref<6x3xf32, #tpu.memory_space<vmem>>, %arg3: memref<1x6xf32, #tpu.memory_space<vmem>>, %arg4: memref<32x6xf32, #tpu.memory_space<vmem>>) attributes {dimension_semantics = [#tpu.dimension_semantics<parallel>], iteration_bounds = array<i64: 1>, scalar_prefetch = 0 : i64, scratch_operands = 0 : i64, tpu.core_type = #tpu.core_type<tc>, window_params = [{transform_indices = @transform_0, window_bounds = array<i64: 32, 3>}, {pipeline_mode = #tpu.pipeline_mode<synchronous>, transform_indices = @transform_1, window_bounds = array<i64: 6, 3>}, {pipeline_mode = #tpu.pipeline_mode<synchronous>, transform_indices = @transform_2, window_bounds = array<i64: 1, 6>}, {transform_indices = @transform_3, window_bounds = array<i64: 32, 6>}]} {
    %c0 = arith.constant 0 : index
    %c0_0 = arith.constant 0 : index
    %0 = vector.load %arg1[%c0, %c0_0] : memref<32x3xf32, #tpu.memory_space<vmem>>, vector<32x3xf32>
    %c0_1 = arith.constant 0 : index
    %c0_2 = arith.constant 0 : index
    %1 = vector.load %arg2[%c0_1, %c0_2] : memref<6x3xf32, #tpu.memory_space<vmem>>, vector<6x3xf32>
    %cst = arith.constant dense<0.000000e+00> : vector<32x6xf32>
    %2 = tpu.matmul %0, %1, %cst {dimension_numbers = #tpu.dot_dimension_numbers<[1], [1], [0], [0], [0, 0, 1, 0], [], []>} : vector<32x3xf32>, vector<6x3xf32>, vector<32x6xf32> -> vector<32x6xf32>
    %3 = arith.mulf %0, %0 : vector<32x3xf32>
    %cst_3 = arith.constant dense<0.000000e+00> : vector<32xf32>
    %4 = vector.multi_reduction <add>, %3, %cst_3 [1] : vector<32x3xf32> to vector<32xf32>
    %5 = vector.shape_cast %4 : vector<32xf32> to vector<32x1xf32>
    %cst_4 = arith.constant 2.000000e+00 : f32
    %6 = vector.broadcast %cst_4 : f32 to vector<32x6xf32>
    %7 = arith.mulf %6, %2 : vector<32x6xf32>
    %8 = vector.broadcast %5 : vector<32x1xf32> to vector<32x6xf32>
    %9 = arith.subf %8, %7 : vector<32x6xf32>
    %c0_5 = arith.constant 0 : index
    %c0_6 = arith.constant 0 : index
    %10 = vector.load %arg3[%c0_5, %c0_6] : memref<1x6xf32, #tpu.memory_space<vmem>>, vector<1x6xf32>
    %11 = vector.broadcast %10 : vector<1x6xf32> to vector<32x6xf32>
    %12 = arith.addf %9, %11 : vector<32x6xf32>
    %cst_7 = arith.constant 0.000000e+00 : f32
    %13 = vector.broadcast %cst_7 : f32 to vector<32x6xf32>
    %14 = arith.maximumf %12, %13 : vector<32x6xf32>
    %c0_8 = arith.constant 0 : index
    %c0_9 = arith.constant 0 : index
    %15 = vector.load %arg4[%c0_8, %c0_9] : memref<32x6xf32, #tpu.memory_space<vmem>>, vector<32x6xf32>
    tpu.vector_store %arg4[%c0_8, %c0_9], %14 {strides = array<i32>} : memref<32x6xf32, #tpu.memory_space<vmem>>, vector<32x6xf32>,
    return
  }
  func.func @transform_0(%arg0: i32) -> (i32, i32) {
    %c0_i32 = arith.constant 0 : i32
    %c0_i32_0 = arith.constant 0 : i32
    return %arg0, %c0_i32 : i32, i32
  }
  func.func @transform_1(%arg0: i32) -> (i32, i32) {
    %c0_i32 = arith.constant 0 : i32
    %c0_i32_0 = arith.constant 0 : i32
    %c0_i32_1 = arith.constant 0 : i32
    return %c0_i32, %c0_i32_0 : i32, i32
  }
  func.func @transform_2(%arg0: i32) -> (i32, i32) {
    %c0_i32 = arith.constant 0 : i32
    %c0_i32_0 = arith.constant 0 : i32
    %c0_i32_1 = arith.constant 0 : i32
    return %c0_i32, %c0_i32_0 : i32, i32
  }
  func.func @transform_3(%arg0: i32) -> (i32, i32) {
    %c0_i32 = arith.constant 0 : i32
    %c0_i32_0 = arith.constant 0 : i32
    return %arg0, %c0_i32 : i32, i32
  }
}

</mosaic_0001>

<bundles_post_ra>
// kernel: tpu_custom_call.1
= control target key start
LH: loop header
LB: loop body
LE: loop exit
PB: predicated region body
PF: predicated region fallthrough
CT: control target
= control target key end

     0   :  { %vm19_vm0 = vcmask 23552   ;;  %vm159_vm1 = vcmask 48128   ;;  %s251_s1 = inlined_call_operand.vmem [shape: f32[6,3], index: 1, kind: input, shape index: {}]   ;;  %s252_s0 = inlined_call_operand.vmem [shape: f32[32,3], index: 0, kind: input, shape index: {}]   ;;  %s253_s2 = inlined_call_operand.vmem [shape: f32[1,6], index: 2, kind: input, shape index: {}]   ;;  %s254_s3 = inlined_call_operand.vmem [shape: f32[32,6], index: 3, kind: output, shape index: {}]  }
   0x1   :  { %v18_v0 = vld [vmem:[%s251_s1] sm:$0x3f]  ;;  %v16_v2 = vld [vmem:[%s252_s0 + $0x10] sm:$0xff]  ;;  %v15_v5 = vld [vmem:[%s252_s0 + $0x8] sm:$0xff] }
   0x2   :  { %v14_v1 = vld [vmem:[%s252_s0] sm:$0xff]  ;;  %179 = vmatprep.subr.msk.mxu0 %vm19_vm0, %v18_v0  ;;  %187 = vmatprep.subr.msk.mxu1 %vm19_vm0, %v18_v0  ;;  %v122_v4 = vmul.f32 %v16_v2, %v16_v2  ;;  %v17_v6 = vld [vmem:[%s252_s0 + $0x18] sm:$0xff]  ;;  %v121_v8 = vmul.f32 %v15_v5, %v15_v5 }
   0x3   :  { %v120_v3 = vmul.f32 %v14_v1, %v14_v1  ;;  %180 = vmatpush3.xpose.msk.msra.mxu0 %vm19_vm0, %v18_v0  ;;  %188 = vmatpush3.xpose.msk.msra.mxu1 %vm19_vm0, %v18_v0  ;;  %v123_v7 = vmul.f32 %v17_v6, %v17_v6  ;;  %v173_v24 = vld [vmem:[%s253_s2] ss:$0 sm:$0xff] }
   0x4   :  { %181 = vmatprep.mubr.msk.f32.mxu0 %vm19_vm0, %v14_v1  ;;  %184 = vmatprep.mubr.msk.f32.mxu1 %vm19_vm0, %v16_v2  ;;  %v130_v9 = vsel %vm19_vm0, %v122_v4, 0.0  ;;  %v127_v12 = vsel %vm19_vm0, %v121_v8, 0.0 }
   0x5   :  { %v124_v10 = vsel %vm19_vm0, %v120_v3, 0.0  ;;  %131 = vadd.xlane.f32.xlu1 %v130_v9  ;;  %v133_v11 = vsel %vm19_vm0, %v123_v7, 0.0 }
   0x6   :  { %125 = vadd.xlane.f32.xlu0 %v124_v10  ;;  %182 = vmatmul.mubr.msk.f32.vlgmr.msra.gmra.mrb[0].mxu0 %vm19_vm0, %v15_v5 }
   0x7   :  { %185 = vmatmul.mubr.msk.f32.vlgmr.msra.gmra.mrb[0].mxu1 %vm19_vm0, %v17_v6 }
   0x9   :  { %134 = vadd.xlane.f32.xlu1 %v133_v11 }
   0xa   :  { %128 = vadd.xlane.f32.xlu0 %v127_v12 }
  0x92   :  { %v132_v13 = vpop.xlane.xlu1 %131 }
  0x93   :  { %v126_v14 = vpop.xlane.xlu0 %125 }
  0x96   :  { %v135_v15 = vpop.xlane.xlu1 %134 }
  0x97   :  { %v129_v16 = vpop.xlane.xlu0 %128 }
  0xd9   :  { %v183_v17 = vpop.f32.mrb[0].mxu0 }
  0xda   :  { %v186_v18 = vpop.f32.mrb[0].mxu1  ;;  %v137_v19 = vmul.f32 2.0, %v183_v17  ;;  %v101_v21 = vpop.f32.mrb[1].mxu0 }
  0xdb   :  { %v139_v20 = vmul.f32 2.0, %v186_v18  ;;  %v111_v22 = vpop.f32.mrb[1].mxu1  ;;  %v136_v23 = vmul.f32 2.0, %v101_v21 }
  0xdc   :  { %v138_v25 = vmul.f32 2.0, %v111_v22  ;;  %v141_v27 = vsub.f32 %v129_v16, %v137_v19 }
  0xdd   :  { %v143_v26 = vsub.f32 %v135_v15, %v139_v20  ;;  %v140_v28 = vsub.f32 %v126_v14, %v136_v23 }
  0xde   :  { %v142_v29 = vsub.f32 %v132_v13, %v138_v25  ;;  %v152_v31 = vadd.f32 %v173_v24, %v141_v27 }
  0xdf   :  { %v154_v30 = vadd.f32 %v173_v24, %v143_v26  ;;  %v151_v32 = vadd.f32 %v173_v24, %v140_v28 }
  0xe0   :  { %v153_v33 = vadd.f32 %v173_v24, %v142_v29  ;;  %v156_v35 = vmax.f32 %v152_v31, 0.0 }
  0xe1   :  { %v158_v34 = vmax.f32 %v154_v30, 0.0  ;;  %v155_v36 = vmax.f32 %v151_v32, 0.0 }
  0xe2   :  { %v157_v37 = vmax.f32 %v153_v33, 0.0  ;;  %161 = vst.msk [vmem:[%s254_s3 + $0x8] sm:$0xff] %vm159_vm1, %v156_v35 }
  0xe3   :  { %163 = vst.msk [vmem:[%s254_s3 + $0x18] sm:$0xff] %vm159_vm1, %v158_v34  ;;  %160 = vst.msk [vmem:[%s254_s3] sm:$0xff] %vm159_vm1, %v155_v36 }
  0xe4   :  { %162 = vst.msk [vmem:[%s254_s3 + $0x10] sm:$0xff] %vm159_vm1, %v157_v37 }

</bundles_post_ra>
